<compile_context>
chip_gen: v6e
topology: v6e:2x2x1
jax: 0.10.0
libtpu: 0.0.40
codegen_flags: <defaults>
</compile_context>

<pallas_src>
import jax
import jax.numpy as jnp
import numpy as np
from jax.experimental import pallas as pl
from jax.experimental.pallas import tpu as pltpu

KERNEL_SIZE = 31
PAD = (KERNEL_SIZE - 1) // 2
C_IN = 2
C_CONV = 32
C_OUT = 128
K_FOLD = KERNEL_SIZE * C_IN   # 62 = 31 taps x 2 channels
K_PAD = 64                    # contraction dim padded to a lane-friendly size

M_TILE_CAP = 4096             # ~2.6 MB/tile (bf16 LHS + f32 out); ~5-6 MB dbl-buffered
MIN_GRID_STEPS = 4            # >= 2 grid steps per v7x TensorCore keeps DMA pipelined


def _location_kernel(x_ref, w_ref, out_ref):
    # x_ref:   (m_tile, 64)   bf16  im2col rows
    # w_ref:   (64, 128)      bf16  folded conv+dense weight
    # out_ref: (m_tile, 128)  out dtype (f32 by default)
    out_ref[...] = jnp.dot(
        x_ref[...], w_ref[...], preferred_element_type=jnp.float32
    ).astype(out_ref.dtype)


def _choose_m_tile(m):
    """Pick the M tile: big enough to amortize ~0.35us/grid-step overhead, small
    enough to keep >= MIN_GRID_STEPS steps (2 per v7x core) when M is large."""
    if m <= 512:
        # Tiny problem: one tile, rounded to bf16-native 16-row sublane packing.
        return max(16, ((m + 15) // 16) * 16)
    steps = max(MIN_GRID_STEPS, pl.cdiv(m, M_TILE_CAP))
    m_tile = ((pl.cdiv(m, steps) + 511) // 512) * 512     # multiple of 512
    return max(512, min(M_TILE_CAP, m_tile))


def _fold_weights(conv_w, dense_w):
    """Fold Conv1d(2->32,k=31) and Linear(32->128) into one (64,128) bf16 matrix.

    W_comb[k*2 + c, f] = sum_o conv_w[o, c, k] * dense_w[f, o]
    """
    wc = jnp.transpose(conv_w, (2, 1, 0))                  # (31, 2, 32)
    w_comb = jnp.einsum("kco,fo->kcf", wc, dense_w)        # (31, 2, 128) f32
    w_comb = w_comb.reshape(K_FOLD, C_OUT)                 # (62, 128)
    w_comb = jnp.pad(w_comb, ((0, K_PAD - K_FOLD), (0, 0)))  # (64, 128)
    return w_comb.astype(jnp.bfloat16)


def _im2col_bf16(x_ncw, m_pad):
    """(B, 2, T) NCW f32 -> (m_pad, 64) bf16 im2col matrix.

    Cast to bf16 FIRST so every intermediate (transpose/pad/slices/concat) is
    half the bytes; K pad (62->64) and M pad (B*T -> m_pad) are one jnp.pad.
    """
    B, C, T = x_ncw.shape
    x_nwc = jnp.transpose(x_ncw.astype(jnp.bfloat16), (0, 2, 1))    # (B, T, 2)
    x_halo = jnp.pad(x_nwc, ((0, 0), (PAD, PAD), (0, 0)))           # (B, T+30, 2)
    cols = [x_halo[:, k:k + T, :] for k in range(KERNEL_SIZE)]      # 31 x (B,T,2)
    x_col = jnp.concatenate(cols, axis=-1).reshape(B * T, K_FOLD)   # (B*T, 62)
    return jnp.pad(x_col, ((0, m_pad - B * T), (0, K_PAD - K_FOLD)))


def location_layer(attention_weights_cat, conv_w, dense_w, *, out_dtype=jnp.float32):
    """attention_weights_cat: (B, 2, T) float32 (PyTorch NCW layout).

    conv_w : (32, 2, 31)  Conv1d weight (out_ch, in_ch, k)
    dense_w: (128, 32)    Linear weight (out_feat, in_feat)
    returns: (B, T, 128) in out_dtype (float32 by default = module semantics)
    """
    B, C, T = attention_weights_cat.shape
    assert C == C_IN
    M = B * T

    m_tile = _choose_m_tile(M)
    grid_m = pl.cdiv(M, m_tile)
    m_pad = grid_m * m_tile

    x_col = _im2col_bf16(attention_weights_cat, m_pad)     # (m_pad, 64) bf16
    w_comb = _fold_weights(conv_w, dense_w)                # (64, 128)   bf16

    out_flat = pl.pallas_call(
        _location_kernel,
        out_shape=jax.ShapeDtypeStruct((m_pad, C_OUT), out_dtype),
        grid_spec=pltpu.PrefetchScalarGridSpec(
            num_scalar_prefetch=0,
            grid=(grid_m,),
            in_specs=[
                pl.BlockSpec((m_tile, K_PAD), lambda m: (m, 0)),
                pl.BlockSpec((K_PAD, C_OUT), lambda m: (0, 0)),
            ],
            out_specs=pl.BlockSpec((m_tile, C_OUT), lambda m: (m, 0)),
        ),
        compiler_params=pltpu.CompilerParams(
            dimension_semantics=("parallel",),
            vmem_limit_bytes=32 * 1024 * 1024,
        ),
    )(x_col, w_comb)

    return out_flat[:M].reshape(B, T, C_OUT)


def _reference_f32(x, conv_w, dense_w):
    """Pure-JAX f32 reference matching the PyTorch module semantics."""
    B, C, T = x.shape
    x_nwc = jnp.transpose(x, (0, 2, 1))
    x_halo = jnp.pad(x_nwc, ((0, 0), (PAD, PAD), (0, 0)))
    wc = jnp.transpose(conv_w, (2, 1, 0))                  # (31, 2, 32)
    conv_out = jnp.zeros((B, T, C_CONV), jnp.float32)
    for k in range(KERNEL_SIZE):
        conv_out = conv_out + jnp.einsum("btc,co->bto", x_halo[:, k:k + T, :], wc[k])
    return jnp.einsum("bto,fo->btf", conv_out, dense_w)


def _reference_bf16(x, conv_w, dense_w):
    """Same folded bf16 math as the kernel (f32 accumulate) in plain JAX."""
    B, C, T = x.shape
    x_col = _im2col_bf16(x, B * T).astype(jnp.float32)
    w_comb = _fold_weights(conv_w, dense_w).astype(jnp.float32)
    return (x_col @ w_comb).reshape(B, T, C_OUT)


if __name__ == "__main__":
    key = jax.random.PRNGKey(0)
    k1, k2, k3, k4 = jax.random.split(key, 4)

    conv_w = jax.random.normal(k1, (C_CONV, C_IN, KERNEL_SIZE), jnp.float32) * 0.1
    dense_w = jax.random.normal(k2, (C_OUT, C_CONV), jnp.float32) * 0.1

    fwd = jax.jit(lambda a, cw, dw: location_layer(a, cw, dw))

    # Small shape consistent with the module: (B, 2, T). Single-tile grid.
    B, T = 2, 64
    x = jax.random.normal(k3, (B, C_IN, T), jnp.float32)
    out = jax.block_until_ready(fwd(x, conv_w, dense_w))
    assert out.shape == (B, T, C_OUT), out.shape
    assert out.dtype == jnp.float32, out.dtype

    # Tight check against the same bf16-folded math computed outside Pallas.
    np.testing.assert_allclose(
        np.asarray(out), np.asarray(_reference_bf16(x, conv_w, dense_w)),
        rtol=1e-4, atol=1e-4)
    # Sanity check against the exact f32 PyTorch-equivalent reference
    # (difference is only bf16 input/weight rounding, ~0.4% relative).
    np.testing.assert_allclose(
        np.asarray(out), np.asarray(_reference_f32(x, conv_w, dense_w)),
        rtol=5e-2, atol=5e-2)

    # Slightly larger shape exercising the multi-step grid + M padding path
    # (M = 2100 -> 3 grid steps of 1024 rows, padded to 3072).
    B2, T2 = 3, 700
    x2 = jax.random.normal(k4, (B2, C_IN, T2), jnp.float32)
    out2 = jax.block_until_ready(fwd(x2, conv_w, dense_w))
    assert out2.shape == (B2, T2, C_OUT), out2.shape
    np.testing.assert_allclose(
        np.asarray(out2), np.asarray(_reference_bf16(x2, conv_w, dense_w)),
        rtol=1e-4, atol=1e-4)

    print("KERNEL_OK")
</pallas_src>

<mosaic_0001>
module attributes {stable_mosaic.version = 11 : i64} {
  func.func @_location_kernel(%arg0: i32, %arg1: memref<128x64xbf16, #tpu.memory_space<vmem>>, %arg2: memref<64x128xbf16, #tpu.memory_space<vmem>>, %arg3: memref<128x128xf32, #tpu.memory_space<vmem>>) attributes {dimension_semantics = [#tpu.dimension_semantics<parallel>], iteration_bounds = array<i64: 1>, scalar_prefetch = 0 : i64, scratch_operands = 0 : i64, tpu.core_type = #tpu.core_type<tc>, window_params = [{transform_indices = @transform_0, window_bounds = array<i64: 128, 64>}, {pipeline_mode = #tpu.pipeline_mode<synchronous>, transform_indices = @transform_1, window_bounds = array<i64: 64, 128>}, {transform_indices = @transform_2, window_bounds = array<i64: 128, 128>}]} {
    %c0 = arith.constant 0 : index
    %c0_0 = arith.constant 0 : index
    %0 = vector.load %arg1[%c0, %c0_0] : memref<128x64xbf16, #tpu.memory_space<vmem>>, vector<128x64xbf16>
    %c0_1 = arith.constant 0 : index
    %c0_2 = arith.constant 0 : index
    %1 = vector.load %arg2[%c0_1, %c0_2] : memref<64x128xbf16, #tpu.memory_space<vmem>>, vector<64x128xbf16>
    %cst = arith.constant dense<0.000000e+00> : vector<128x128xf32>
    %2 = tpu.matmul %0, %1, %cst {dimension_numbers = #tpu.dot_dimension_numbers<[1], [0], [0], [1], [0, 0, 1, 1], [], []>} : vector<128x64xbf16>, vector<64x128xbf16>, vector<128x128xf32> -> vector<128x128xf32>
    %c0_3 = arith.constant 0 : index
    %c0_4 = arith.constant 0 : index
    %3 = vector.load %arg3[%c0_3, %c0_4] : memref<128x128xf32, #tpu.memory_space<vmem>>, vector<128x128xf32>
    tpu.vector_store %arg3[%c0_3, %c0_4], %2 {strides = array<i32>} : memref<128x128xf32, #tpu.memory_space<vmem>>, vector<128x128xf32>,
    return
  }
  func.func @transform_0(%arg0: i32) -> (i32, i32) {
    %c0_i32 = arith.constant 0 : i32
    %c0_i32_0 = arith.constant 0 : i32
    return %arg0, %c0_i32 : i32, i32
  }
  func.func @transform_1(%arg0: i32) -> (i32, i32) {
    %c0_i32 = arith.constant 0 : i32
    %c0_i32_0 = arith.constant 0 : i32
    %c0_i32_1 = arith.constant 0 : i32
    return %c0_i32, %c0_i32_0 : i32, i32
  }
  func.func @transform_2(%arg0: i32) -> (i32, i32) {
    %c0_i32 = arith.constant 0 : i32
    %c0_i32_0 = arith.constant 0 : i32
    return %arg0, %c0_i32 : i32, i32
  }
}

</mosaic_0001>

<bundles_post_ra>
// kernel: _lambda_.1
= control target key start
LH: loop header
LB: loop body
LE: loop exit
PB: predicated region body
PF: predicated region fallthrough
CT: control target
= control target key end

     0   :  { %vm101_vm0 = vcmask 523264   ;;  %s421_s0 = inlined_call_operand.vmem [shape: bf16[128,64], index: 0, kind: input, shape index: {}]   ;;  %s422_s1 = inlined_call_operand.vmem [shape: bf16[64,128], index: 1, kind: input, shape index: {}]   ;;  %s423_s2 = inlined_call_operand.hbm [shape: f32[128,128], index: 2, kind: output, shape index: {}]  }
   0x1   :  { %v322_v0 = vld [vmem:[%s422_s1 + $0x18] sm:$0xff]   ;;  %v323_v1 = vld [vmem:[%s422_s1 + $0x10] sm:$0xff]   ;;  %v324_v2 = vld [vmem:[%s422_s1 + $0x8] sm:$0xff]  }
   0x2   :  { %287 = vmatprep.subr.bf16.mxu0 %v322_v0  ;;  %311 = vmatprep.subr.bf16.mxu1 %v322_v0  ;;  %v326_v3 = vld [vmem:[%s421_s0] sm:$0xff]  }
   0x3   :  { %288 = vmatpush3.bf16.msra.mxu0 %v322_v0  ;;  %315 = vmatpush3.bf16.msra.mxu1 %v322_v0  ;;  %v327_v4 = vld [vmem:[%s421_s0 + $0x20] sm:$0xff]  }
   0x4   :  { %289 = vmatprep.subr.bf16.mxu0 %v323_v1  ;;  %312 = vmatprep.subr.bf16.mxu1 %v323_v1  ;;  %v325_v5 = vld [vmem:[%s422_s1] sm:$0xff]  }
   0x5   :  { %295 = vmatprep.mubr.msk.bf16.mxu0 %vm101_vm0, %v326_v3  ;;  %303 = vmatprep.mubr.msk.bf16.mxu1 %vm101_vm0, %v327_v4 }
   0x7   :  { %290 = vmatpush3.bf16.msra.mxu0 %v323_v1  ;;  %316 = vmatpush3.bf16.msra.mxu1 %v323_v1 }
   0x8   :  { %291 = vmatprep.subr.bf16.mxu0 %v324_v2  ;;  %313 = vmatprep.subr.bf16.mxu1 %v324_v2 }
   0xb   :  { %292 = vmatpush3.bf16.msra.mxu0 %v324_v2  ;;  %317 = vmatpush3.bf16.msra.mxu1 %v324_v2 }
   0xc   :  { %293 = vmatprep.subr.bf16.mxu0 %v325_v5  ;;  %314 = vmatprep.subr.bf16.mxu1 %v325_v5 }
   0xd   :  { %7 = vsyncpa [#allocation3], 0  ;;  %v328_v6 = vld [vmem:[%s421_s0 + $0x8] sm:$0xff]   ;;  %v330_v8 = vld [vmem:[%s421_s0 + $0x10] sm:$0xff]  }
   0xe   :  { %v329_v7 = vld [vmem:[%s421_s0 + $0x28] sm:$0xff]   ;;  %v331_v9 = vld [vmem:[%s421_s0 + $0x30] sm:$0xff]   ;;  %v332_v10 = vld [vmem:[%s421_s0 + $0x18] sm:$0xff]  }
   0xf   :  { %294 = vmatpush3.bf16.msra.mxu0 %v325_v5  ;;  %318 = vmatpush3.bf16.msra.mxu1 %v325_v5  ;;  %v333_v11 = vld [vmem:[%s421_s0 + $0x38] sm:$0xff]   ;;  %s356_s0 = smov [#allocation2]  }
  0x10   :  { %s244_s4 = sshll.u32 %s356_s0, 4  ;;  %s245_s4 = int_to_ptr.vmem [resolvable:$true] %s244_s4 }
  0x11   :  { %s334_s5 = scalar_lea.vmem %s245_s4, 2048  ;;  %p339_p1 = scmp.lt.s32.totalorder %s245_s4, %s245_s4 }
  0x12   :  { %296 = vmatmul.mubr.msk.bf16.vlgmr.msra.gmra.mxu0 %vm101_vm0, %v328_v6  ;;  %304 = vmatmul.mubr.msk.bf16.vlgmr.msra.gmra.mxu1 %vm101_vm0, %v329_v7  ;;  %p335_p0 = scmp.ne.s32.totalorder %s245_s4, %s334_s5  ;;  %p340_p2 = scmp.lt.s32.totalorder %s334_s5, %s334_s5 }
  0x13   :  { %299 = vmatprep.mubr.msk.bf16.mxu0 %vm101_vm0, %v330_v8  ;;  %307 = vmatprep.mubr.msk.bf16.mxu1 %vm101_vm0, %v331_v9 }
  0x14   :  { %p341_p3 = por %p340_p2, %p339_p1 }
  0x16   :  { %p342_p4 = pnand %p341_p3, %p335_p0 }
  0x1a   :  { %300 = vmatmul.mubr.msk.bf16.gmra.mxu0 %vm101_vm0, %v332_v10  ;;  %308 = vmatmul.mubr.msk.bf16.gmra.mxu1 %vm101_vm0, %v333_v11 }
  0xd2   :  { %v297_v12 = vpop.f32.mrf.mxu0  ;;  %v305_v13 = vpop.f32.mrf.mxu1 }
  0xd3   :  { %225 = vst [vmem:[#allocation2 + $0x10] sm:$0xff] %v297_v12  ;;  %233 = vst [vmem:[#allocation2 + $0x50] sm:$0xff] %v305_v13 }
  0xd4   :  { %v160_v14 = vpop.f32.mrf.mxu0  ;;  %v192_v15 = vpop.f32.mrf.mxu1 }
  0xd5   :  { %223 = vst [vmem:[#allocation2] sm:$0xff] %v160_v14  ;;  %231 = vst [vmem:[#allocation2 + $0x40] sm:$0xff] %v192_v15 }
  0xd6   :  { %v298_v16 = vpop.f32.mrf.mxu0  ;;  %v306_v17 = vpop.f32.mrf.mxu1 }
  0xd7   :  { %226 = vst [vmem:[#allocation2 + $0x18] sm:$0xff] %v298_v16  ;;  %234 = vst [vmem:[#allocation2 + $0x58] sm:$0xff] %v306_v17 }
  0xd8   :  { %v163_v18 = vpop.f32.mrf.mxu0  ;;  %v195_v19 = vpop.f32.mrf.mxu1 }
  0xd9   :  { %224 = vst [vmem:[#allocation2 + $0x8] sm:$0xff] %v163_v18  ;;  %232 = vst [vmem:[#allocation2 + $0x48] sm:$0xff] %v195_v19 }
  0xda   :  { %v301_v20 = vpop.f32.mrf.mxu0  ;;  %v309_v21 = vpop.f32.mrf.mxu1 }
  0xdb   :  { %229 = vst [vmem:[#allocation2 + $0x30] sm:$0xff] %v301_v20  ;;  %237 = vst [vmem:[#allocation2 + $0x70] sm:$0xff] %v309_v21 }
  0xdc   :  { %v176_v22 = vpop.f32.mrf.mxu0  ;;  %v208_v23 = vpop.f32.mrf.mxu1 }
  0xdd   :  { %227 = vst [vmem:[#allocation2 + $0x20] sm:$0xff] %v176_v22  ;;  %235 = vst [vmem:[#allocation2 + $0x60] sm:$0xff] %v208_v23 }
  0xde   :  { %v302_v24 = vpop.f32.mrf.mxu0  ;;  %v310_v25 = vpop.f32.mrf.mxu1 }
  0xdf   :  { %230 = vst [vmem:[#allocation2 + $0x38] sm:$0xff] %v302_v24  ;;  %238 = vst [vmem:[#allocation2 + $0x78] sm:$0xff] %v310_v25 }
  0xe0   :  { %v179_v26 = vpop.f32.mrf.mxu0  ;;  %v211_v27 = vpop.f32.mrf.mxu1 }
  0xe1   :  { %228 = vst [vmem:[#allocation2 + $0x28] sm:$0xff] %v179_v26  ;;  %236 = vst [vmem:[#allocation2 + $0x68] sm:$0xff] %v211_v27 }
  0xe2   :  { %345 = shalt.err (!%p342_p4)
}
  0xe3   :  { %s357_s6 = smov 128   ;;  %s358_s7 = smov 8  }
  0xe4   :  { %250 = dma.vmem_to_hbm [thread:$0]  %s245_s4, 2048, %s423_s2, [#allocation3], %s357_s6, %s357_s6, %s358_s7  }
  0xe5   :  { %354 = dma.done.wait [#allocation3], 2048  }
  0xe6   :  { %355 = vsyncadd [#allocation3], 4294965248 }
  0xe7   :  { %254 = vsyncpa [#allocation3], 1 }

</bundles_post_ra>
